<compile_context>
chip_gen: v6e
topology: v6e:2x2x1
jax: 0.10.0
libtpu: 0.0.40
codegen_flags: <defaults>
</compile_context>

<pallas_src>
import functools

import jax
import jax.numpy as jnp
from jax.experimental import pallas as pl
from jax.experimental.pallas import tpu as pltpu

ETA = 0.05
HIDDEN = 32
TILE_N = 2048  # max points per grid step (lanes axis)


def _round_up(x, m):
    return ((x + m - 1) // m) * m


def _cdiv(a, b):
    return -(-a // b)


def _choose_tiling(n, max_tile=TILE_N):
    """Balanced tiles: padding < 128 points per tile; grid >= 2 when possible."""
    n128 = _round_up(n, 128)
    num_tiles = _cdiv(n128, max_tile)
    # v7x has 2 TensorCores: keep the parallel grid axis length >= 2 whenever
    # there is enough work to split (no-op cost on v5e/v6e single-TC chips).
    if num_tiles == 1 and n128 >= 256:
        num_tiles = 2
    tile_n = _round_up(_cdiv(n128, num_tiles), 128)
    n_pad = num_tiles * tile_n
    return tile_n, n_pad, num_tiles


def _neural_self_kernel(kx_ref, ky_ref, w_ref,
                        w1_ref, b1_ref, w2_ref, b2_ref, w3_ref, b3_ref,
                        re_ref, im_ref, *, eta):
    kx = kx_ref[...]            # (1, TN)
    ky = ky_ref[...]            # (1, TN)
    w = w_ref[...]              # (1, TN)

    # Layer 1 as three rank-1 broadcast contributions (keeps everything
    # lane-dense, avoids the awkward K=3 MXU matmul and any in-kernel concat).
    w1 = w1_ref[...]            # (2H, 3)
    pre1 = (w1[:, 0:1] * kx + w1[:, 1:2] * ky + w1[:, 2:3] * w
            + b1_ref[...])      # (2H, TN)
    h = jnp.tanh(pre1)

    h = jnp.tanh(
        jnp.dot(w2_ref[...], h,
                preferred_element_type=jnp.float32,
                precision=jax.lax.Precision.HIGHEST)
        + b2_ref[...]
    )                           # (2H, TN)
    y = (jnp.dot(w3_ref[...], h,
                 preferred_element_type=jnp.float32,
                 precision=jax.lax.Precision.HIGHEST)
         + b3_ref[...])         # (2, TN); row 0 = delta, row 1 = xi

    delta = y[0:1, :]           # (1, TN)
    xi = y[1:2, :]              # (1, TN)

    delta_sq = delta * delta
    diff = w - xi
    eta_sq = jnp.float32(eta * eta)
    inv = pl.reciprocal(diff * diff + eta_sq, approx=False)  # shared, exact
    common = delta_sq * inv

    re_ref[...] = common * diff      # (1, TN) full-block lane-dense store
    im_ref[...] = common * eta_sq    # (1, TN) full-block lane-dense store


def _fuse_params(params):
    """Pack the two ThreeToOneNN parameter sets into one transposed fused MLP."""
    dw1, db1, dw2, db2, dw3, db3 = [p.astype(jnp.float32) for p in params["delta"]]
    xw1, xb1, xw2, xb2, xw3, xb3 = [p.astype(jnp.float32) for p in params["xi"]]
    h = dw1.shape[1]
    z_hh = jnp.zeros((h, h), jnp.float32)
    z_1h = jnp.zeros((1, h), jnp.float32)

    w1f = jnp.concatenate([dw1.T, xw1.T], axis=0)                     # (2H, 3)
    b1f = jnp.concatenate([db1.T, xb1.T], axis=0)                     # (2H, 1)
    w2f = jnp.concatenate(
        [jnp.concatenate([dw2.T, z_hh], axis=1),
         jnp.concatenate([z_hh, xw2.T], axis=1)], axis=0)             # (2H, 2H)
    b2f = jnp.concatenate([db2.T, xb2.T], axis=0)                     # (2H, 1)
    w3f = jnp.concatenate(
        [jnp.concatenate([dw3.T, z_1h], axis=1),
         jnp.concatenate([z_1h, xw3.T], axis=1)], axis=0)             # (2, 2H)
    b3f = jnp.concatenate([db3, xb3], axis=0)                         # (2, 1)
    return w1f, b1f, w2f, b2f, w3f, b3f


def neural_self(kx, ky, w, params, *, eta=ETA, max_tile=TILE_N):
    """params: dict with 'delta' and 'xi' -> (w1,b1,w2,b2,w3,b3), w1: (3,H)."""
    n = kx.shape[0]
    tile_n, n_pad, num_tiles = _choose_tiling(n, max_tile)

    def as_row(a):
        a = a.astype(jnp.float32).reshape(1, n)
        if n_pad != n:
            a = jnp.pad(a, ((0, 0), (0, n_pad - n)))
        return a

    kx2, ky2, w2 = as_row(kx), as_row(ky), as_row(w)
    fused = _fuse_params(params)

    def full_spec(p):
        nd = p.ndim
        return pl.BlockSpec(p.shape, lambda i, _nd=nd: (0,) * _nd)

    pts_spec = pl.BlockSpec((1, tile_n), lambda i: (0, i))

    re, im = pl.pallas_call(
        functools.partial(_neural_self_kernel, eta=eta),
        out_shape=(jax.ShapeDtypeStruct((1, n_pad), jnp.float32),
                   jax.ShapeDtypeStruct((1, n_pad), jnp.float32)),
        grid=(num_tiles,),
        in_specs=[pts_spec, pts_spec, pts_spec] + [full_spec(p) for p in fused],
        out_specs=(pl.BlockSpec((1, tile_n), lambda i: (0, i)),
                   pl.BlockSpec((1, tile_n), lambda i: (0, i))),
        compiler_params=pltpu.CompilerParams(
            dimension_semantics=("parallel",)
        ),
    )(kx2, ky2, w2, *fused)

    return re[0, :n], im[0, :n]


def init_three_to_one(key, hidden=HIDDEN):
    k1, k2, k3 = jax.random.split(key, 3)
    w1 = jax.random.normal(k1, (3, hidden), jnp.float32) * 0.5
    b1 = jnp.zeros((1, hidden), jnp.float32)
    w2 = jax.random.normal(k2, (hidden, hidden), jnp.float32) * (1.0 / hidden**0.5)
    b2 = jnp.zeros((1, hidden), jnp.float32)
    w3 = jax.random.normal(k3, (hidden, 1), jnp.float32) * (1.0 / hidden**0.5)
    b3 = jnp.zeros((1, 1), jnp.float32)
    return (w1, b1, w2, b2, w3, b3)


def _mlp_ref(x, p):
    w1, b1, w2, b2, w3, b3 = p
    h = jnp.tanh(x @ w1 + b1)
    h = jnp.tanh(h @ w2 + b2)
    return (h @ w3 + b3)[:, 0]


def neural_self_ref(kx, ky, w, params, eta=ETA):
    x = jnp.stack([kx, ky, w], axis=-1)
    delta_sq = _mlp_ref(x, params["delta"]) ** 2
    diff = w - _mlp_ref(x, params["xi"])
    eta_sq = eta * eta
    denom = diff * diff + eta_sq
    return delta_sq * diff / denom, delta_sq * eta_sq / denom


if __name__ == "__main__":
    key = jax.random.PRNGKey(0)
    k_delta, k_xi, k_kx, k_ky, k_w = jax.random.split(key, 5)

    N = 256
    kx = jax.random.normal(k_kx, (N,), jnp.float32)
    ky = jax.random.normal(k_ky, (N,), jnp.float32)
    w = jax.random.normal(k_w, (N,), jnp.float32)

    params = {
        "delta": init_three_to_one(k_delta),
        "xi": init_three_to_one(k_xi),
    }

    re, im = neural_self(kx, ky, w, params)
    jax.block_until_ready((re, im))

    re_ref, im_ref = neural_self_ref(kx, ky, w, params)
    assert jnp.allclose(re, re_ref, atol=1e-4, rtol=1e-4), float(
        jnp.max(jnp.abs(re - re_ref))
    )
    assert jnp.allclose(im, im_ref, atol=1e-4, rtol=1e-4), float(
        jnp.max(jnp.abs(im - im_ref))
    )

    # Also exercise an awkward (non-multiple-of-128) N to cover the balanced
    # tiling / padding path.
    N2 = 300
    kx2 = jax.random.normal(k_kx, (N2,), jnp.float32)
    ky2 = jax.random.normal(k_ky, (N2,), jnp.float32)
    w2 = jax.random.normal(k_w, (N2,), jnp.float32)
    re2, im2 = neural_self(kx2, ky2, w2, params)
    jax.block_until_ready((re2, im2))
    re2_ref, im2_ref = neural_self_ref(kx2, ky2, w2, params)
    assert jnp.allclose(re2, re2_ref, atol=1e-4, rtol=1e-4)
    assert jnp.allclose(im2, im2_ref, atol=1e-4, rtol=1e-4)

    print("KERNEL_OK")
</pallas_src>

<mosaic_0001>
module attributes {stable_mosaic.version = 11 : i64} {
  func.func @_neural_self_kernel(%arg0: i32, %arg1: memref<1x128xf32, #tpu.memory_space<vmem>>, %arg2: memref<1x128xf32, #tpu.memory_space<vmem>>, %arg3: memref<1x128xf32, #tpu.memory_space<vmem>>, %arg4: memref<64x3xf32, #tpu.memory_space<vmem>>, %arg5: memref<64x1xf32, #tpu.memory_space<vmem>>, %arg6: memref<64x64xf32, #tpu.memory_space<vmem>>, %arg7: memref<64x1xf32, #tpu.memory_space<vmem>>, %arg8: memref<2x64xf32, #tpu.memory_space<vmem>>, %arg9: memref<2x1xf32, #tpu.memory_space<vmem>>, %arg10: memref<1x128xf32, #tpu.memory_space<vmem>>, %arg11: memref<1x128xf32, #tpu.memory_space<vmem>>) attributes {dimension_semantics = [#tpu.dimension_semantics<parallel>], iteration_bounds = array<i64: 2>, scalar_prefetch = 0 : i64, scratch_operands = 0 : i64, tpu.core_type = #tpu.core_type<tc>, window_params = [{transform_indices = @transform_0, window_bounds = array<i64: 1, 128>}, {transform_indices = @transform_1, window_bounds = array<i64: 1, 128>}, {transform_indices = @transform_2, window_bounds = array<i64: 1, 128>}, {pipeline_mode = #tpu.pipeline_mode<synchronous>, transform_indices = @transform_3, window_bounds = array<i64: 64, 3>}, {pipeline_mode = #tpu.pipeline_mode<synchronous>, transform_indices = @transform_4, window_bounds = array<i64: 64, 1>}, {pipeline_mode = #tpu.pipeline_mode<synchronous>, transform_indices = @transform_5, window_bounds = array<i64: 64, 64>}, {pipeline_mode = #tpu.pipeline_mode<synchronous>, transform_indices = @transform_6, window_bounds = array<i64: 64, 1>}, {pipeline_mode = #tpu.pipeline_mode<synchronous>, transform_indices = @transform_7, window_bounds = array<i64: 2, 64>}, {pipeline_mode = #tpu.pipeline_mode<synchronous>, transform_indices = @transform_8, window_bounds = array<i64: 2, 1>}, {transform_indices = @transform_9, window_bounds = array<i64: 1, 128>}, {transform_indices = @transform_10, window_bounds = array<i64: 1, 128>}]} {
    %c0 = arith.constant 0 : index
    %c0_0 = arith.constant 0 : index
    %0 = vector.load %arg1[%c0, %c0_0] : memref<1x128xf32, #tpu.memory_space<vmem>>, vector<1x128xf32>
    %c0_1 = arith.constant 0 : index
    %c0_2 = arith.constant 0 : index
    %1 = vector.load %arg2[%c0_1, %c0_2] : memref<1x128xf32, #tpu.memory_space<vmem>>, vector<1x128xf32>
    %c0_3 = arith.constant 0 : index
    %c0_4 = arith.constant 0 : index
    %2 = vector.load %arg3[%c0_3, %c0_4] : memref<1x128xf32, #tpu.memory_space<vmem>>, vector<1x128xf32>
    %c0_5 = arith.constant 0 : index
    %c0_6 = arith.constant 0 : index
    %3 = vector.load %arg4[%c0_5, %c0_6] : memref<64x3xf32, #tpu.memory_space<vmem>>, vector<64x3xf32>
    %4 = vector.extract_strided_slice %3 {offsets = [0, 0], sizes = [64, 1], strides = [1, 1]} : vector<64x3xf32> to vector<64x1xf32>
    %5 = vector.broadcast %4 : vector<64x1xf32> to vector<64x128xf32>
    %6 = vector.broadcast %0 : vector<1x128xf32> to vector<64x128xf32>
    %7 = arith.mulf %5, %6 : vector<64x128xf32>
    %8 = vector.extract_strided_slice %3 {offsets = [0, 1], sizes = [64, 1], strides = [1, 1]} : vector<64x3xf32> to vector<64x1xf32>
    %9 = vector.broadcast %8 : vector<64x1xf32> to vector<64x128xf32>
    %10 = vector.broadcast %1 : vector<1x128xf32> to vector<64x128xf32>
    %11 = arith.mulf %9, %10 : vector<64x128xf32>
    %12 = arith.addf %7, %11 : vector<64x128xf32>
    %13 = vector.extract_strided_slice %3 {offsets = [0, 2], sizes = [64, 1], strides = [1, 1]} : vector<64x3xf32> to vector<64x1xf32>
    %14 = vector.broadcast %13 : vector<64x1xf32> to vector<64x128xf32>
    %15 = vector.broadcast %2 : vector<1x128xf32> to vector<64x128xf32>
    %16 = arith.mulf %14, %15 : vector<64x128xf32>
    %17 = arith.addf %12, %16 : vector<64x128xf32>
    %c0_7 = arith.constant 0 : index
    %c0_8 = arith.constant 0 : index
    %18 = vector.load %arg5[%c0_7, %c0_8] : memref<64x1xf32, #tpu.memory_space<vmem>>, vector<64x1xf32>
    %19 = vector.broadcast %18 : vector<64x1xf32> to vector<64x128xf32>
    %20 = arith.addf %17, %19 : vector<64x128xf32>
    %21 = math.tanh %20 : vector<64x128xf32>
    %c0_9 = arith.constant 0 : index
    %c0_10 = arith.constant 0 : index
    %22 = vector.load %arg6[%c0_9, %c0_10] : memref<64x64xf32, #tpu.memory_space<vmem>>, vector<64x64xf32>
    %cst = arith.constant dense<0.000000e+00> : vector<64x128xf32>
    %23 = tpu.matmul %22, %21, %cst {dimension_numbers = #tpu.dot_dimension_numbers<[1], [0], [0], [1], [0, 0, 1, 1], [], []>, precision = #tpu.contract_precision<fp32>} : vector<64x64xf32>, vector<64x128xf32>, vector<64x128xf32> -> vector<64x128xf32>
    %c0_11 = arith.constant 0 : index
    %c0_12 = arith.constant 0 : index
    %24 = vector.load %arg7[%c0_11, %c0_12] : memref<64x1xf32, #tpu.memory_space<vmem>>, vector<64x1xf32>
    %25 = vector.broadcast %24 : vector<64x1xf32> to vector<64x128xf32>
    %26 = arith.addf %23, %25 : vector<64x128xf32>
    %27 = math.tanh %26 : vector<64x128xf32>
    %c0_13 = arith.constant 0 : index
    %c0_14 = arith.constant 0 : index
    %28 = vector.load %arg8[%c0_13, %c0_14] : memref<2x64xf32, #tpu.memory_space<vmem>>, vector<2x64xf32>
    %cst_15 = arith.constant dense<0.000000e+00> : vector<2x128xf32>
    %29 = tpu.matmul %28, %27, %cst_15 {dimension_numbers = #tpu.dot_dimension_numbers<[1], [0], [0], [1], [0, 0, 1, 1], [], []>, precision = #tpu.contract_precision<fp32>} : vector<2x64xf32>, vector<64x128xf32>, vector<2x128xf32> -> vector<2x128xf32>
    %c0_16 = arith.constant 0 : index
    %c0_17 = arith.constant 0 : index
    %30 = vector.load %arg9[%c0_16, %c0_17] : memref<2x1xf32, #tpu.memory_space<vmem>>, vector<2x1xf32>
    %31 = vector.broadcast %30 : vector<2x1xf32> to vector<2x128xf32>
    %32 = arith.addf %29, %31 : vector<2x128xf32>
    %33 = vector.extract_strided_slice %32 {offsets = [0, 0], sizes = [1, 128], strides = [1, 1]} : vector<2x128xf32> to vector<1x128xf32>
    %34 = vector.extract_strided_slice %32 {offsets = [1, 0], sizes = [1, 128], strides = [1, 1]} : vector<2x128xf32> to vector<1x128xf32>
    %35 = arith.mulf %33, %33 : vector<1x128xf32>
    %36 = arith.subf %2, %34 : vector<1x128xf32>
    %37 = arith.mulf %36, %36 : vector<1x128xf32>
    %cst_18 = arith.constant 2.500000e-03 : f32
    %38 = vector.broadcast %cst_18 : f32 to vector<1x128xf32>
    %39 = arith.addf %37, %38 : vector<1x128xf32>
    %40 = tpu.reciprocal %39 : vector<1x128xf32> -> vector<1x128xf32>
    %41 = arith.mulf %35, %40 : vector<1x128xf32>
    %42 = arith.mulf %41, %36 : vector<1x128xf32>
    %c0_19 = arith.constant 0 : index
    %c0_20 = arith.constant 0 : index
    %43 = vector.load %arg10[%c0_19, %c0_20] : memref<1x128xf32, #tpu.memory_space<vmem>>, vector<1x128xf32>
    tpu.vector_store %arg10[%c0_19, %c0_20], %42 {strides = array<i32>} : memref<1x128xf32, #tpu.memory_space<vmem>>, vector<1x128xf32>,
    %cst_21 = arith.constant 2.500000e-03 : f32
    %44 = vector.broadcast %cst_21 : f32 to vector<1x128xf32>
    %45 = arith.mulf %41, %44 : vector<1x128xf32>
    %c0_22 = arith.constant 0 : index
    %c0_23 = arith.constant 0 : index
    %46 = vector.load %arg11[%c0_22, %c0_23] : memref<1x128xf32, #tpu.memory_space<vmem>>, vector<1x128xf32>
    tpu.vector_store %arg11[%c0_22, %c0_23], %45 {strides = array<i32>} : memref<1x128xf32, #tpu.memory_space<vmem>>, vector<1x128xf32>,
    return
  }
  func.func @transform_0(%arg0: i32) -> (i32, i32) {
    %c0_i32 = arith.constant 0 : i32
    %c0_i32_0 = arith.constant 0 : i32
    return %c0_i32, %arg0 : i32, i32
  }
  func.func @transform_1(%arg0: i32) -> (i32, i32) {
    %c0_i32 = arith.constant 0 : i32
    %c0_i32_0 = arith.constant 0 : i32
    return %c0_i32, %arg0 : i32, i32
  }
  func.func @transform_2(%arg0: i32) -> (i32, i32) {
    %c0_i32 = arith.constant 0 : i32
    %c0_i32_0 = arith.constant 0 : i32
    return %c0_i32, %arg0 : i32, i32
  }
  func.func @transform_3(%arg0: i32) -> (i32, i32) {
    %c0_i32 = arith.constant 0 : i32
    %c0_i32_0 = arith.constant 0 : i32
    %c0_i32_1 = arith.constant 0 : i32
    return %c0_i32, %c0_i32_0 : i32, i32
  }
  func.func @transform_4(%arg0: i32) -> (i32, i32) {
    %c0_i32 = arith.constant 0 : i32
    %c0_i32_0 = arith.constant 0 : i32
    %c0_i32_1 = arith.constant 0 : i32
    return %c0_i32, %c0_i32_0 : i32, i32
  }
  func.func @transform_5(%arg0: i32) -> (i32, i32) {
    %c0_i32 = arith.constant 0 : i32
    %c0_i32_0 = arith.constant 0 : i32
    %c0_i32_1 = arith.constant 0 : i32
    return %c0_i32, %c0_i32_0 : i32, i32
  }
  func.func @transform_6(%arg0: i32) -> (i32, i32) {
    %c0_i32 = arith.constant 0 : i32
    %c0_i32_0 = arith.constant 0 : i32
    %c0_i32_1 = arith.constant 0 : i32
    return %c0_i32, %c0_i32_0 : i32, i32
  }
  func.func @transform_7(%arg0: i32) -> (i32, i32) {
    %c0_i32 = arith.constant 0 : i32
    %c0_i32_0 = arith.constant 0 : i32
    %c0_i32_1 = arith.constant 0 : i32
    return %c0_i32, %c0_i32_0 : i32, i32
  }
  func.func @transform_8(%arg0: i32) -> (i32, i32) {
    %c0_i32 = arith.constant 0 : i32
    %c0_i32_0 = arith.constant 0 : i32
    %c0_i32_1 = arith.constant 0 : i32
    return %c0_i32, %c0_i32_0 : i32, i32
  }
  func.func @transform_9(%arg0: i32) -> (i32, i32) {
    %c0_i32 = arith.constant 0 : i32
    %c0_i32_0 = arith.constant 0 : i32
    return %c0_i32, %arg0 : i32, i32
  }
  func.func @transform_10(%arg0: i32) -> (i32, i32) {
    %c0_i32 = arith.constant 0 : i32
    %c0_i32_0 = arith.constant 0 : i32
    return %c0_i32, %arg0 : i32, i32
  }
}

</mosaic_0001>

<bundles_post_ra>
// kernel: tpu_custom_call.1
= control target key start
LH: loop header
LB: loop body
LE: loop exit
PB: predicated region body
PF: predicated region fallthrough
CT: control target
= control target key end

     0   :  { %s3736_s0 = inlined_call_operand.vmem [shape: f32[1,256], index: 0, kind: input, shape index: {}]   ;;  %s3737_s1 = inlined_call_operand.vmem [shape: f32[1,256], index: 1, kind: input, shape index: {}]   ;;  %s3738_s2 = inlined_call_operand.vmem [shape: f32[1,256], index: 2, kind: input, shape index: {}]   ;;  %s3739_s3 = inlined_call_operand.vmem [shape: f32[64,3], index: 3, kind: input, shape index: {}]   ;;  %s3740_s4 = inlined_call_operand.vmem [shape: f32[64,1], index: 4, kind: input, shape index: {}]   ;;  %s3741_s5 = inlined_call_operand.vmem [shape: f32[64,64], index: 5, kind: input, shape index: {}]   ;;  %s3742_s6 = inlined_call_operand.vmem [shape: f32[64,1], index: 6, kind: input, shape index: {}]   ;;  %s3743_s7 = inlined_call_operand.vmem [shape: f32[2,64], index: 7, kind: input, shape index: {}]   ;;  %s3744_s8 = inlined_call_operand.vmem [shape: f32[2,1], index: 8, kind: input, shape index: {}]   ;;  %s3745_s9 = inlined_call_operand.hbm [shape: f32[1,256], index: 9, kind: output, shape index: {0}]   ;;  %s3746_s10 = inlined_call_operand.hbm [shape: f32[1,256], index: 10, kind: output, shape index: {1}]  }
   0x1   :  { %3747 = sst [smem:[#allocation8_spill]] %s3736_s0 }
   0x2   :  { %3748 = sst [smem:[#allocation9_spill]] %s3737_s1 }
   0x3   :  { %3749 = sst [smem:[#allocation10_spill]] %s3738_s2 }
   0x4   :  { %16 = vsyncpa [#allocation3], 0 }
   0x5   :  { %18 = vsyncpa [#allocation3 + $0x1], 0 }
   0x6   :  { %19 = vsyncpa [#allocation5], 0 }
   0x7   :  { %21 = vsyncpa [#allocation5 + $0x1], 0  ;;  %s2958_s13 = smov 0   ;;  %s2960_s14 = smov 0  }
   0x8   :  { %s2962_s15 = smov 0   ;;  %s2964_s16 = smov 0  }
   0x9 LB: > { %s2979_s17 = sadd.s32 4294967295, %s2893_s16   ;;  %s2255_s18 = sadd.s32 4294967294, %s2893_s16   ;;  %s2893_s16 = sphi %s2964_s16, %s3758_s16   ;;  %s2889_s15 = sphi %s2962_s15, %s3757_s15   ;;  %s2885_s14 = sphi %s2960_s14, %s3756_s14   ;;  %s2881_s13 = sphi %s2958_s13, %s3755_s13  }
   0xa   : > { %s2983_s19 = sadd.s32 1, %s2893_s16   ;;  %s238_s20 = sadd.s32 1, %s2889_s15 }
   0xb   : > { %s235_s21 = ssub.s32 %s2893_s16, %s2983_s19  ;;  %p248_p0 = scmp.ne.s32.totalorder %s2889_s15, %s2885_s14 }
   0xc   : > { %p236_p1 = scmp.eq.s32.totalorder %s235_s21, 0  ;;  %p249_p2 = scmp.eq.s32.totalorder %s2979_s17, 1 }
   0xd   : > { %p254_p3 = scmp.ne.s32.totalorder %s2885_s14, %s2881_s13  ;;  %p255_p4 = scmp.eq.s32.totalorder %s2255_s18, 1 }
   0xe   : > { %s2994_s22 = scalar_select %p236_p1, %s2889_s15, %s238_s20  }
   0xf   : > { %p2996_p5 = por %p249_p2, %p248_p0  ;;  %p3000_p6 = por %p255_p4, %p254_p3 }
  0x10   : > { %p2258_p7 = scmp.ge.s32.totalorder %s2893_s16, 1  ;;  %p335_p8 = scmp.lt.s32.totalorder %s2893_s16, 3 }
  0x12   : > { %p336_p9 = pnand %p2258_p7, %p335_p8 }
  0x13   : > { %p380_p10 = scmp.lt.s32.totalorder (!%p336_p9), %s2979_s17, 1  ;;  %s3752_s0 = sld [smem:[#allocation8_spill]] (!%p336_p9) }
  0x14   : > { %339 = sbr.rel (%p336_p9) target bundleno = 857 (0x359), region = 56  ;;  %s3753_s2 = sld [smem:[#allocation10_spill]] (!%p336_p9) }
  0x15   : > { %s3754_s1 = sld [smem:[#allocation9_spill]] (!%p336_p9)  ;;  %s3658_s27 = sand.u32 (!%p336_p9), 1, %s2885_s14  }
  0x16   : > { %s2261_s29 = sshll.u32 (!%p336_p9), %s2979_s17, 4  ;;  %s373_s30 = scalar_lea.vmem (!%p336_p9), [#allocation2], %s3658_s27 }
  0x17   : > { %s379_s12 = scalar_lea.vmem (!%p336_p9), [#allocation4], %s3658_s27  ;;  %s3666_s21 = scalar_lea.hbm (!%p336_p9), %s3745_s9, %s2261_s29 }
  0x18   : > { %s3673_s26 = scalar_lea.hbm (!%p336_p9), %s3746_s10, %s2261_s29 }
  0x19   : > { %v398_v0 = vld [vmem:[%s3739_s3 + $0x30] sm:$0xff]  ;;  %v397_v1 = vld [vmem:[%s3739_s3 + $0x28] sm:$0xff]  ;;  %v2895_v2 = vmov 2   ;;  %v2896_v3 = vmov 0   ;;  %v399_v4 = vld [vmem:[%s3739_s3 + $0x38] sm:$0xff]  ;;  %v2897_v5 = vmov 1   ;;  %v541_v41 = vlaneseq }
  0x1a   : > { %2753 = vset.pattern.permute.xlu0 %v2895_v2  ;;  %2747 = vset.pattern.permute.xlu1 %v2896_v3  ;;  %v395_v6 = vld [vmem:[%s3739_s3 + $0x18] sm:$0xff]  ;;  %v393_v7 = vld [vmem:[%s3739_s3 + $0x8] sm:$0xff]  ;;  %v396_v8 = vld [vmem:[%s3739_s3 + $0x20] sm:$0xff]  ;;  %vm682_vm0 = vcmask 523264   ;;  %s381_s18 = scalar_select %p380_p10, %s2979_s17, 1  ;;  %vm2899_vm1 = vmmov 0  }
  0x1b   : > { %432 = vperm.xlu1 %2747, %v398_v0   ;;  %529 = vperm.xlu0 %2753, %v397_v1   ;;  %v569_v9 = vld [vmem:[%s3740_s4 + $0x38] sm:$0xff]  ;;  %v394_v10 = vld [vmem:[%s3739_s3 + $0x10] sm:$0xff]  ;;  %v567_v11 = vld [vmem:[%s3740_s4 + $0x28] sm:$0xff]  ;;  %v3113_v43 = vshrl.u32 %v541_v41, 7 }
  0x1c   : > { %v392_v12 = vld [vmem:[%s3739_s3] sm:$0xff]  ;;  %v565_v13 = vld [vmem:[%s3740_s4 + $0x18] sm:$0xff]  ;;  %v568_v14 = vld [vmem:[%s3740_s4 + $0x30] sm:$0xff]  ;;  %s382_s25 = scalar_lea.vmem %s3752_s0, %s381_s18  ;;  %s3121_s28 = scalar_lea.vmem %s3753_s2, %s381_s18 }
  0x1d   : > { %v564_v15 = vld [vmem:[%s3740_s4 + $0x10] sm:$0xff]  ;;  %v562_v16 = vld [vmem:[%s3740_s4] sm:$0xff]  ;;  %v563_v22 = vld [vmem:[%s3740_s4 + $0x8] sm:$0xff]  ;;  %s385_s11 = scalar_lea.vmem %s3754_s1, %s381_s18  ;;  %s2157_s18 = sshll.u32 %s379_s12, 4  ;;  %s3675_s18 = int_to_ptr.vmem [resolvable:$true] %s2157_s18 }
  0x1e   : > { %v640_v17 = vld [vmem:[%s3742_s6 + $0x30] sm:$0xff]  ;;  %v638_v18 = vld [vmem:[%s3742_s6 + $0x20] sm:$0xff]  ;;  %v641_v23 = vld [vmem:[%s3742_s6 + $0x38] sm:$0xff]  ;;  %s2128_s0 = scalar_lea.sflag [#allocation3], %s3658_s27 }
  0x1f   : > { %2748 = vset.pattern.permute.xlu1 %v2897_v5  ;;  %2754 = vset.pattern.permute.xlu0 %v2897_v5  ;;  %v636_v19 = vld [vmem:[%s3742_s6 + $0x10] sm:$0xff]  ;;  %v634_v20 = vld [vmem:[%s3742_s6] sm:$0xff]  ;;  %v639_v24 = vld [vmem:[%s3742_s6 + $0x28] sm:$0xff] }
  0x20   : > { %479 = vperm.xlu1 %2748, %v398_v0   ;;  %483 = vperm.xlu0 %2754, %v399_v4   ;;  %v566_v21 = vld [vmem:[%s3740_s4 + $0x20] sm:$0xff]  ;;  %v637_v28 = vld [vmem:[%s3742_s6 + $0x18] sm:$0xff]  ;;  %v635_v31 = vld [vmem:[%s3742_s6 + $0x8] sm:$0xff] }
  0x21   : > { %v626_v25 = vld [vmem:[%s3741_s5] sm:$0xff] }
  0x22   : > { %v684_v26 = vsel %vm682_vm0, %v626_v25, 0  ;;  %v1554_v34 = vld [vmem:[%s3744_s8] sm:$0x3] }
  0x23   : > { %v3090_v27 = vand.u32 4294901760, %v684_v26  ;;  %v3126_v46 = vld [vmem:[%s382_s25] ss:$0 sm:$0xff] }
  0x24   : > { %2749 = vset.pattern.permute.xlu1 %v2895_v2  ;;  %467 = vperm.xlu0 %2754, %v395_v6   ;;  %v3129_v47 = vld [vmem:[%s3121_s28] ss:$0 sm:$0xff] }
  0x25   : > { %537 = vperm.xlu1 %2749, %v399_v4   ;;  %v3096_v29 = vsub.f32 %v684_v26, %v3090_v27  ;;  %2459 = vmatprep.mubr.f32.mxu1 %v3090_v27  ;;  %v3131_v48 = vld [vmem:[%s385_s11] ss:$0 sm:$0xff]  ;;  %s2144_s11 = sshll.u32 %s373_s30, 4  ;;  %s3668_s11 = int_to_ptr.vmem [resolvable:$true] %s2144_s11 }
  0x26   : > { %s2803_s20 = scalar_lea.vmem %s3668_s11, 16 }
  0x27   : > { %v782_v30 = vand.u32 4294901760, %v3096_v29  ;;  %p2804_p11 = scmp.ne.s32.totalorder %s3668_s11, %s2803_s20 }
  0x28   : > { %459 = vperm.xlu0 %2754, %v393_v7  }
  0x29   : > { %2750 = vset.pattern.permute.xlu1 %v2897_v5  ;;  %v783_v32 = vsub.f32 %v3096_v29, %v782_v30  ;;  %p2805_p12 = pnand %p2804_p11, %p2996_p5 }
  0x2a   : > { %475 = vperm.xlu1 %2750, %v397_v1  }
  0x2b   : > { %v784_v33 = vand.u32 4294901760, %v783_v32  ;;  %p2806_p13 = pneg %p2805_p12 }
  0x2c   : > { %2761 = vset.pattern.permute.xlu0 %v2896_v3 }
  0x2d   : > { %437 = vperm.xlu0 %2761, %v399_v4   ;;  %2431 = vmatprep.mubr.f32.mxu0 %v784_v33 }
  0x2e   : > { %2751 = vset.pattern.permute.xlu1 %v2895_v2 }
  0x2f   : > { %533 = vperm.xlu1 %2751, %v398_v0  }
  0x31   : > { %427 = vperm.xlu0 %2761, %v397_v1  }
  0x33   : > { %2752 = vset.pattern.permute.xlu1 %v2897_v5 }
  0x34   : > { %471 = vperm.xlu1 %2752, %v396_v8  }
  0x35   : > { %422 = vperm.xlu0 %2761, %v396_v8  }
  0x38   : > { %2755 = vset.pattern.permute.xlu1 %v2896_v3 }
  0x39   : > { %607 = vperm.xlu1 %2755, %v569_v9   ;;  %412 = vperm.xlu0 %2761, %v394_v10  }
  0x3d   : > { %417 = vperm.xlu1 %2755, %v395_v6   ;;  %597 = vperm.xlu0 %2761, %v567_v11  }
  0x41   : > { %2756 = vset.pattern.permute.xlu1 %v2895_v2  ;;  %402 = vperm.xlu0 %2761, %v392_v12  }
  0x42   : > { %525 = vperm.xlu1 %2756, %v396_v8  }
  0x45   : > { %587 = vperm.xlu0 %2761, %v565_v13  }
  0x46   : > { %2757 = vset.pattern.permute.xlu1 %v2896_v3 }
  0x47   : > { %602 = vperm.xlu1 %2757, %v568_v14  }
  0x49   : > { %582 = vperm.xlu0 %2761, %v564_v15  }
  0x4b   : > { %2758 = vset.pattern.permute.xlu1 %v2897_v5 }
  0x4c   : > { %463 = vperm.xlu1 %2758, %v394_v10  }
  0x4d   : > { %572 = vperm.xlu0 %2761, %v562_v16  }
  0x50   : > { %2759 = vset.pattern.permute.xlu1 %v2895_v2 }
  0x51   : > { %521 = vperm.xlu1 %2759, %v395_v6   ;;  %674 = vperm.xlu0 %2761, %v640_v17  }
  0x55   : > { %2760 = vset.pattern.permute.xlu1 %v2896_v3  ;;  %664 = vperm.xlu0 %2761, %v638_v18  }
  0x56   : > { %407 = vperm.xlu1 %2760, %v393_v7  }
  0x59   : > { %654 = vperm.xlu0 %2761, %v636_v19  }
  0x5a   : > { %2762 = vset.pattern.permute.xlu1 %v2895_v2 }
  0x5b   : > { %517 = vperm.xlu1 %2762, %v394_v10  }
  0x5d   : > { %644 = vperm.xlu0 %2761, %v634_v20  }
  0x5f   : > { %2763 = vset.pattern.permute.xlu1 %v2896_v3 }
  0x60   : > { %592 = vperm.xlu1 %2763, %v566_v21  }
  0x64   : > { %2764 = vset.pattern.permute.xlu1 %v2897_v5 }
  0x65   : > { %455 = vperm.xlu1 %2764, %v392_v12  }
  0x69   : > { %2765 = vset.pattern.permute.xlu1 %v2895_v2 }
  0x6a   : > { %513 = vperm.xlu1 %2765, %v393_v7  }
  0x6e   : > { %509 = vperm.xlu1 %2765, %v392_v12  }
  0x72   : > { %2766 = vset.pattern.permute.xlu1 %v2896_v3 }
  0x73   : > { %577 = vperm.xlu1 %2766, %v563_v22  }
  0x77   : > { %679 = vperm.xlu1 %2766, %v641_v23  }
  0x7b   : > { %669 = vperm.xlu1 %2766, %v639_v24  }
  0x7f   : > { %659 = vperm.xlu1 %2766, %v637_v28  }
  0x83   : > { %649 = vperm.xlu1 %2766, %v635_v31  }
  0x87   : > { %1557 = vperm.xlu1 %2766, %v1554_v34  }
  0x96   : > { %v433_v35 = vpop.permute.xlu1 %432  ;;  %v530_v36 = vpop.permute.xlu0 %529 }
  0x97   : > { %v551_v59 = vmul.f32 %v3129_v47, %v530_v36  ;;  %v452_v6 = vmul.f32 %v3126_v46, %v433_v35 }
  0x9b   : > { %v480_v37 = vpop.permute.xlu1 %479  ;;  %v484_v38 = vpop.permute.xlu0 %483 }
  0x9c   : > { %v499_v50 = vmul.f32 %v3131_v48, %v484_v38  ;;  %v498_v5 = vmul.f32 %v3131_v48, %v480_v37 }
  0x9e   : > { %v506_v9 = vadd.f32 %v498_v5, %v452_v6 }
  0x9f   : > { %v468_v39 = vpop.permute.xlu0 %467 }
  0xa0   : > { %v538_v40 = vpop.permute.xlu1 %537  ;;  %v495_v17 = vmul.f32 %v3131_v48, %v468_v39 }
  0xa1   : > { %v553_v57 = vmul.f32 %v3129_v47, %v538_v40 }
  0xa3   : > { %v3111_v42 = vpop.permute.xlu0 %459 }
  0xa5   : > { %v476_v44 = vpop.permute.xlu1 %475 }
  0xa6   : > { %v497_v58 = vmul.f32 %v3131_v48, %v476_v44 }
  0xa8   : > { %v438_v45 = vpop.permute.xlu0 %437 }
  0xa9   : > { %v453_v51 = vmul.f32 %v3126_v46, %v438_v45 }
  0xaa   : > { %v534_v49 = vpop.permute.xlu1 %533 }
  0xab   : > { %v507_v53 = vadd.f32 %v499_v50, %v453_v51  ;;  %v552_v7 = vmul.f32 %v3129_v47, %v534_v49 }
  0xac   : > { %v428_v52 = vpop.permute.xlu0 %427 }
  0xad   : > { %v451_v54 = vmul.f32 %v3126_v46, %v428_v52  ;;  %v561_v61 = vadd.f32 %v553_v57, %v507_v53  ;;  %v560_v10 = vadd.f32 %v552_v7, %v506_v9 }
  0xaf   : > { %v472_v55 = vpop.permute.xlu1 %471  ;;  %v505_v60 = vadd.f32 %v497_v58, %v451_v54 }
  0xb0   : > { %v423_v56 = vpop.permute.xlu0 %422  ;;  %v496_v40 = vmul.f32 %v3131_v48, %v472_v55 }
  0xb1   : > { %v559_v1 = vadd.f32 %v551_v59, %v505_v60  ;;  %v450_v41 = vmul.f32 %v3126_v46, %v423_v56 }
  0xb3   : > { %v504_v54 = vadd.f32 %v496_v40, %v450_v41 }
  0xb4   : > { %v608_v62 = vpop.permute.xlu1 %607  ;;  %v413_v63 = vpop.permute.xlu0 %412 }
  0xb5   : > { %v617_v0 = vadd.f32 %v608_v62, %v561_v61  ;;  %v448_v37 = vmul.f32 %v3126_v46, %v413_v63 }
  0xb7   : > { %2767 = vtanh.f32 %v617_v0 }
  0xb8   : > { %v418_v2 = vpop.permute.xlu1 %417  ;;  %v598_v3 = vpop.permute.xlu0 %597 }
  0xb9   : > { %v615_v4 = vadd.f32 %v598_v3, %v559_v1  ;;  %v449_v18 = vmul.f32 %v3126_v46, %v418_v2 }
  0xbb   : > { %2769 = vtanh.f32 %v615_v4  ;;  %v503_v24 = vadd.f32 %v495_v17, %v449_v18 }
  0xbc   : > { %v403_v21 = vpop.permute.xlu0 %402 }
  0xbd   : > { %v526_v8 = vpop.permute.xlu1 %525  ;;  %v446_v7 = vmul.f32 %v3126_v46, %v403_v21 }
  0xbe   : > { %v550_v49 = vmul.f32 %v3129_v47, %v526_v8  ;;  %v493_v8 = vmul.f32 %v3131_v48, %v3111_v42 }
  0xc0   : > { %v588_v32 = vpop.permute.xlu0 %587  ;;  %v558_v59 = vadd.f32 %v550_v49, %v504_v54 }
  0xc2   : > { %v603_v11 = vpop.permute.xlu1 %602 }
  0xc3   : > { %v616_v12 = vadd.f32 %v603_v11, %v560_v10 }
  0xc4   : > { %v2768_v13 = vpop.eup %2767  ;;  %v583_v58 = vpop.permute.xlu0 %582 }
  0xc5   : > { %v3142_v14 = vand.u32 4294901760, %v2768_v13  ;;  %2771 = vtanh.f32 %v616_v12 }
  0xc7   : > { %v464_v15 = vpop.permute.xlu1 %463  ;;  %2415 = vmatprep.subr.mxu0 %v3142_v14  ;;  %v3146_v16 = vsub.f32 %v2768_v13, %v3142_v14 }
  0xc8   : > { %2416 = vmatpush3.msra.mxu0 %v3142_v14  ;;  %v2770_v20 = vpop.eup %2769  ;;  %v494_v39 = vmul.f32 %v3131_v48, %v464_v15 }
  0xc9   : > { %v3152_v19 = vand.u32 4294901760, %v3146_v16  ;;  %v3156_v25 = vand.u32 4294901760, %v2770_v20 }
  0xca   : > { %v502_v51 = vadd.f32 %v494_v39, %v448_v37 }
  0xcb   : > { %v880_v22 = vsub.f32 %v3146_v16, %v3152_v19  ;;  %v3160_v34 = vsub.f32 %v2770_v20, %v3156_v25 }
  0xcc   : > { %v522_v23 = vpop.permute.xlu1 %521 }
  0xcd   : > { %v549_v26 = vmul.f32 %v3129_v47, %v522_v23  ;;  %v881_v28 = vand.u32 4294901760, %v880_v22  ;;  %v3173_v45 = vand.u32 4294901760, %v3160_v34  ;;  %v573_v22 = vpop.permute.xlu0 %572 }
  0xcf   : > { %v557_v31 = vadd.f32 %v549_v26, %v503_v24  ;;  %2443 = vmatprep.subr.mxu1 %v881_v28  ;;  %v894_v57 = vsub.f32 %v3160_v34, %v3173_v45 }
  0xd0   : > { %2444 = vmatpush3.msra.mxu1 %v881_v28 }
  0xd1   : > { %v408_v33 = vpop.permute.xlu1 %407  ;;  %v613_v36 = vadd.f32 %v588_v32, %v557_v31  ;;  %v895_v0 = vand.u32 4294901760, %v894_v57 }
  0xd2   : > { %v2772_v35 = vpop.eup %2771  ;;  %v447_v6 = vmul.f32 %v3126_v46, %v408_v33  ;;  %v627_v46 = vld [vmem:[%s3741_s5 + $0x8] sm:$0xff] }
  0xd3   : > { %v3163_v38 = vand.u32 4294901760, %v2772_v35  ;;  %2773 = vtanh.f32 %v613_v36  ;;  %v687_v32 = vsel %vm682_vm0, %v627_v46, 0  ;;  %v629_v36 = vld [vmem:[%s3741_s5 + $0x18] sm:$0xff] }
  0xd4   : > { %v501_v18 = vadd.f32 %v493_v8, %v447_v6  ;;  %v3233_v40 = vand.u32 4294901760, %v687_v32 }
  0xd5   : > { %2417 = vmatprep.subr.mxu0 %v3163_v38  ;;  %v3170_v44 = vsub.f32 %v2772_v35, %v3163_v38 }
  0xd6   : > { %v518_v50 = vpop.permute.xlu1 %517  ;;  %2418 = vmatpush3.msra.mxu0 %v3163_v38  ;;  %v3253_v57 = vsub.f32 %v687_v32, %v3233_v40 }
  0xd7   : > { %v548_v52 = vmul.f32 %v3129_v47, %v518_v50  ;;  %2419 = vmatprep.subr.mxu0 %v3156_v25  ;;  %v3180_v53 = vand.u32 4294901760, %v3170_v44 }
  0xd8   : > { %2420 = vmatpush3.msra.mxu0 %v3156_v25 }
  0xd9   : > { %v556_v55 = vadd.f32 %v548_v52, %v502_v51  ;;  %v887_v56 = vsub.f32 %v3170_v44, %v3180_v53  ;;  %v693_v51 = vsel %vm682_vm0, %v629_v36, 0  ;;  %v630_v52 = vld [vmem:[%s3741_s5 + $0x20] sm:$0xff] }
  0xdb   : > { %v612_v60 = vadd.f32 %v583_v58, %v556_v55  ;;  %v593_v61 = vpop.permute.xlu1 %592  ;;  %v888_v62 = vand.u32 4294901760, %v887_v56  ;;  %v631_v56 = vld [vmem:[%s3741_s5 + $0x28] sm:$0xff]  ;;  %v3255_v58 = vand.u32 4294901760, %v693_v51 }
  0xdc   : > { %v614_v63 = vadd.f32 %v593_v61, %v558_v59  ;;  %v696_v59 = vsel %vm682_vm0, %v630_v52, 0 }
  0xdd   : > { %2775 = vtanh.f32 %v612_v60  ;;  %2445 = vmatprep.subr.mxu1 %v888_v62 }
  0xde   : > { %2777 = vtanh.f32 %v614_v63  ;;  %2446 = vmatpush3.msra.mxu1 %v888_v62  ;;  %v699_v62 = vsel %vm682_vm0, %v631_v56, 0 }
  0xdf   : > { %2447 = vmatprep.subr.mxu1 %v895_v0  ;;  %v3272_v6 = vand.u32 4294901760, %v699_v62 }
  0xe0   : > { %v456_v1 = vpop.permute.xlu1 %455  ;;  %2448 = vmatpush3.msra.mxu1 %v895_v0  ;;  %v2774_v2 = vpop.eup %2773  ;;  %v3262_v0 = vand.u32 4294901760, %v696_v59 }
  0xe1   : > { %v3187_v4 = vand.u32 4294901760, %v2774_v2  ;;  %v492_v5 = vmul.f32 %v3131_v48, %v456_v1  ;;  %v628_v48 = vld [vmem:[%s3741_s5 + $0x10] sm:$0xff] }
  0xe2   : > { %v690_v35 = vsel %vm682_vm0, %v628_v48, 0  ;;  %v632_v1 = vld [vmem:[%s3741_s5 + $0x30] sm:$0xff] }
  0xe3   : > { %v500_v12 = vadd.f32 %v492_v5, %v446_v7  ;;  %v3197_v15 = vsub.f32 %v2774_v2, %v3187_v4  ;;  %v3240_v50 = vand.u32 4294901760, %v690_v35  ;;  %v792_v2 = vand.u32 4294901760, %v3253_v57  ;;  %v633_v7 = vld [vmem:[%s3741_s5 + $0x38] sm:$0xff] }
  0xe4   : > { %v702_v8 = vsel %vm682_vm0, %v632_v1, 0 }
  0xe5   : > { %v514_v3 = vpop.permute.xlu1 %513  ;;  %v3217_v31 = vand.u32 4294901760, %v3197_v15  ;;  %v3259_v61 = vsub.f32 %v690_v35, %v3240_v50  ;;  %v3294_v48 = vand.u32 4294901760, %v702_v8 }
  0xe6   : > { %v547_v9 = vmul.f32 %v3129_v47, %v514_v3  ;;  %v3269_v3 = vsub.f32 %v693_v51, %v3255_v58 }
  0xe7   : > { %v908_v49 = vsub.f32 %v3197_v15, %v3217_v31  ;;  %v802_v5 = vand.u32 4294901760, %v3259_v61  ;;  %v3315_v51 = vsub.f32 %v702_v8, %v3294_v48 }
  0xe9   : > { %v510_v10 = vpop.permute.xlu1 %509  ;;  %v909_v60 = vand.u32 4294901760, %v908_v49  ;;  %v803_v46 = vsub.f32 %v3259_v61, %v802_v5 }
  0xea   : > { %v2776_v11 = vpop.eup %2775  ;;  %v546_v13 = vmul.f32 %v3129_v47, %v510_v10  ;;  %v555_v47 = vadd.f32 %v547_v9, %v501_v18  ;;  %v3279_v9 = vsub.f32 %v696_v59, %v3262_v0 }
  0xeb   : > { %v2778_v17 = vpop.eup %2777  ;;  %v3199_v20 = vand.u32 4294901760, %v2776_v11  ;;  %v804_v36 = vand.u32 4294901760, %v803_v46 }
  0xec   : > { %v3204_v21 = vand.u32 4294901760, %v2778_v17  ;;  %v554_v42 = vadd.f32 %v546_v13, %v500_v12  ;;  %v812_v12 = vand.u32 4294901760, %v3269_v3  ;;  %v705_v13 = vsel %vm682_vm0, %v633_v7, 0 }
  0xed   : > { %v3210_v23 = vsub.f32 %v2776_v11, %v3199_v20  ;;  %v793_v11 = vsub.f32 %v3253_v57, %v792_v2 }
  0xee   : > { %v610_v24 = vadd.f32 %v573_v22, %v554_v42  ;;  %v578_v26 = vpop.permute.xlu1 %577  ;;  %2421 = vmatprep.subr.mxu0 %v3204_v21  ;;  %v3214_v28 = vsub.f32 %v2778_v17, %v3204_v21  ;;  %v3292_v42 = vsub.f32 %v699_v62, %v3272_v6 }
  0xef   : > { %v611_v33 = vadd.f32 %v578_v26, %v555_v47  ;;  %2422 = vmatpush3.msra.mxu0 %v3204_v21  ;;  %v3230_v39 = vand.u32 4294901760, %v3210_v23  ;;  %v3302_v26 = vand.u32 4294901760, %v705_v13  ;;  %v794_v32 = vand.u32 4294901760, %v793_v11 }
  0xf0   : > { %2779 = vtanh.f32 %v610_v24  ;;  %2423 = vmatprep.subr.mxu0 %v3187_v4  ;;  %v3227_v37 = vand.u32 4294901760, %v3214_v28  ;;  %v822_v24 = vand.u32 4294901760, %v3279_v9  ;;  %v832_v49 = vand.u32 4294901760, %v3292_v42 }
  0xf1   : > { %2781 = vtanh.f32 %v611_v33  ;;  %2424 = vmatpush3.msra.mxu0 %v3187_v4  ;;  %v915_v55 = vsub.f32 %v3210_v23, %v3230_v39  ;;  %v813_v33 = vsub.f32 %v3269_v3, %v812_v12 }
  0xf2   : > { %2425 = vmatprep.subr.mxu0 %v3199_v20  ;;  %v901_v41 = vsub.f32 %v3214_v28, %v3227_v37  ;;  %v833_v62 = vsub.f32 %v3292_v42, %v832_v49 }
  0xf3   : > { %2426 = vmatpush3.msra.mxu0 %v3199_v20  ;;  %v916_v63 = vand.u32 4294901760, %v915_v55  ;;  %v3325_v55 = vsub.f32 %v705_v13, %v3302_v26  ;;  %v814_v56 = vand.u32 4294901760, %v813_v33 }
  0xf4   : > { %v902_v54 = vand.u32 4294901760, %v901_v41 }
  0xf5   : > { %v852_v8 = vand.u32 4294901760, %v3325_v55 }
  0xf6   : > { %2449 = vmatprep.subr.mxu1 %v902_v54 }
  0xf7   : > { %2450 = vmatpush3.msra.mxu1 %v902_v54  ;;  %v823_v54 = vsub.f32 %v3279_v9, %v822_v24 }
  0xf8   : > { %2451 = vmatprep.subr.mxu1 %v909_v60 }
  0xf9   : > { %2452 = vmatpush3.msra.mxu1 %v909_v60  ;;  %v824_v7 = vand.u32 4294901760, %v823_v54 }
  0xfa   : > { %2453 = vmatprep.subr.mxu1 %v916_v63 }
  0xfb   : > { %2454 = vmatpush3.msra.mxu1 %v916_v63  ;;  %v842_v63 = vand.u32 4294901760, %v3315_v51 }
  0xfd   : > { %v2780_v10 = vpop.eup %2779  ;;  %v843_v11 = vsub.f32 %v3315_v51, %v842_v63 }
  0xfe   : > { %v2782_v17 = vpop.eup %2781  ;;  %v3286_v18 = vand.u32 4294901760, %v2780_v10 }
  0xff   : > { %v3296_v22 = vand.u32 4294901760, %v2782_v17  ;;  %v844_v13 = vand.u32 4294901760, %v843_v11 }
 0x100   : > { %v3299_v47 = vsub.f32 %v2780_v10, %v3286_v18 }
 0x101   : > { %2427 = vmatprep.subr.mxu0 %v3296_v22  ;;  %v920_v35 = vsub.f32 %v2782_v17, %v3296_v22 }
 0x102   : > { %2428 = vmatpush3.msra.mxu0 %v3296_v22  ;;  %v3311_v41 = vand.u32 4294901760, %v3299_v47 }
 0x103   : > { %2429 = vmatprep.subr.mxu0 %v3286_v18  ;;  %v3318_v52 = vand.u32 4294901760, %v920_v35 }
 0x104   : > { %2430 = vmatpush3.msra.mxu0 %v3286_v18  ;;  %v929_v60 = vsub.f32 %v3299_v47, %v3311_v41 }
 0x105   : > { %2432 = vmatmul.mubr.f32.vlgmr.msra.gmra.mxu0 %v794_v32  ;;  %2471 = vmatprep.subr.mxu0 %v3146_v16  ;;  %v922_v59 = vsub.f32 %v920_v35, %v3318_v52 }
 0x106   : > { %2472 = vmatpush3.msra.mxu0 %v3146_v16  ;;  %2434 = vmatprep.mubr.f32.mxu0 %v804_v36  ;;  %v930_v10 = vand.u32 4294901760, %v929_v60  ;;  %v834_v16 = vand.u32 4294901760, %v833_v62 }
 0x107   : > { %2473 = vmatprep.subr.mxu0 %v3170_v44  ;;  %v923_v1 = vand.u32 4294901760, %v922_v59 }
 0x108   : > { %2474 = vmatpush3.msra.mxu0 %v3170_v44  ;;  %v853_v44 = vsub.f32 %v3325_v55, %v852_v8 }
 0x109   : > { %2435 = vmatmul.mubr.f32.gmra.mxu0 %v814_v56  ;;  %2455 = vmatprep.subr.mxu1 %v923_v1 }
 0x10a   : > { %2475 = vmatprep.subr.mxu0 %v3160_v34  ;;  %2456 = vmatpush3.msra.mxu1 %v923_v1 }
 0x10b   : > { %2476 = vmatpush3.msra.mxu0 %v3160_v34  ;;  %2457 = vmatprep.subr.mxu1 %v930_v10  ;;  %v854_v34 = vand.u32 4294901760, %v853_v44 }
 0x10c   : > { %2477 = vmatprep.subr.mxu0 %v3214_v28  ;;  %2437 = vmatprep.mubr.f32.mxu0 %v824_v7 }
 0x10d   : > { %2458 = vmatpush3.msra.mxu1 %v930_v10  ;;  %2478 = vmatpush3.msra.mxu0 %v3214_v28 }
 0x10e   : > { %2438 = vmatmul.mubr.f32.gmra.mxu0 %v834_v16  ;;  %2460 = vmatmul.mubr.f32.vlgmr.msra.gmra.mxu1 %v3233_v40 }
 0x10f   : > { %2479 = vmatprep.subr.mxu0 %v3197_v15  ;;  %2499 = vmatprep.subr.mxu1 %v3142_v14 }
 0x110   : > { %2480 = vmatpush3.msra.mxu0 %v3197_v15  ;;  %2500 = vmatpush3.msra.mxu1 %v3142_v14 }
 0x111   : > { %2481 = vmatprep.subr.mxu0 %v3210_v23  ;;  %2501 = vmatprep.subr.mxu1 %v3163_v38 }
 0x112   : > { %2440 = vmatprep.mubr.f32.mxu0 %v844_v13  ;;  %2462 = vmatprep.mubr.f32.mxu1 %v3240_v50 }
 0x113   : > { %2482 = vmatpush3.msra.mxu0 %v3210_v23  ;;  %2502 = vmatpush3.msra.mxu1 %v3163_v38 }
 0x114   : > { %2441 = vmatmul.mubr.f32.gmra.mxu0 %v854_v34  ;;  %2463 = vmatmul.mubr.f32.gmra.mxu1 %v3255_v58 }
 0x115   : > { %2483 = vmatprep.subr.mxu0 %v920_v35  ;;  %2503 = vmatprep.subr.mxu1 %v3156_v25 }
 0x116   : > { %2484 = vmatpush3.msra.mxu0 %v920_v35  ;;  %2504 = vmatpush3.msra.mxu1 %v3156_v25 }
 0x117   : > { %2485 = vmatprep.subr.mxu0 %v3299_v47  ;;  %2505 = vmatprep.subr.mxu1 %v3204_v21 }
 0x118   : > { %2465 = vmatprep.mubr.f32.mxu1 %v3262_v0  ;;  %2486 = vmatpush3.msra.mxu0 %v3299_v47 }
 0x119   : > { %2487 = vmatprep.mubr.f32.mxu0 %v3096_v29  ;;  %2506 = vmatpush3.msra.mxu1 %v3204_v21 }
 0x11a   : > { %2466 = vmatmul.mubr.f32.gmra.mxu1 %v3272_v6  ;;  %2488 = vmatmul.mubr.f32.vlgmr.msra.gmra.mxu0 %v3253_v57 }
 0x11b   : > { %2507 = vmatprep.subr.mxu1 %v3187_v4  ;;  %2527 = vmatprep.subr.mxu0 %v3152_v19 }
 0x11c   : > { %2508 = vmatpush3.msra.mxu1 %v3187_v4  ;;  %2528 = vmatpush3.msra.mxu0 %v3152_v19 }
 0x11d   : > { %2509 = vmatprep.subr.mxu1 %v3199_v20  ;;  %2529 = vmatprep.subr.mxu0 %v3180_v53 }
 0x11e   : > { %2468 = vmatprep.mubr.f32.mxu1 %v3294_v48  ;;  %2490 = vmatprep.mubr.f32.mxu0 %v3259_v61 }
 0x11f   : > { %2510 = vmatpush3.msra.mxu1 %v3199_v20  ;;  %2530 = vmatpush3.msra.mxu0 %v3180_v53 }
 0x120   : > { %2469 = vmatmul.mubr.f32.gmra.mxu1 %v3302_v26  ;;  %2491 = vmatmul.mubr.f32.gmra.mxu0 %v3269_v3  ;;  %v680_v3 = vpop.permute.xlu1 %679 }
 0x121   : > { %2511 = vmatprep.subr.mxu1 %v3296_v22  ;;  %2531 = vmatprep.subr.mxu0 %v3173_v45 }
 0x122   : > { %2512 = vmatpush3.msra.mxu1 %v3296_v22  ;;  %2532 = vmatpush3.msra.mxu0 %v3173_v45 }
 0x123   : > { %2513 = vmatprep.subr.mxu1 %v3286_v18  ;;  %2533 = vmatprep.subr.mxu0 %v3227_v37 }
 0x124   : > { %2493 = vmatprep.mubr.f32.mxu0 %v3279_v9  ;;  %2514 = vmatpush3.msra.mxu1 %v3286_v18 }
 0x125   : > { %2515 = vmatprep.mubr.f32.mxu1 %v782_v30  ;;  %2534 = vmatpush3.msra.mxu0 %v3227_v37 }
 0x126   : > { %2494 = vmatmul.mubr.f32.gmra.mxu0 %v3292_v42  ;;  %2516 = vmatmul.mubr.f32.vlgmr.msra.gmra.mxu1 %v792_v2 }
 0x127   : > { %2535 = vmatprep.subr.mxu0 %v3217_v31  ;;  %2555 = vmatprep.subr.mxu1 %v3142_v14 }
 0x128   : > { %2536 = vmatpush3.msra.mxu0 %v3217_v31  ;;  %2556 = vmatpush3.msra.mxu1 %v3142_v14 }
 0x129   : > { %2537 = vmatprep.subr.mxu0 %v3230_v39  ;;  %2557 = vmatprep.subr.mxu1 %v3163_v38 }
 0x12a   : > { %2496 = vmatprep.mubr.f32.mxu0 %v3315_v51  ;;  %2518 = vmatprep.mubr.f32.mxu1 %v802_v5  ;;  %v675_v5 = vpop.permute.xlu0 %674 }
 0x12b   : > { %2538 = vmatpush3.msra.mxu0 %v3230_v39  ;;  %2558 = vmatpush3.msra.mxu1 %v3163_v38 }
 0x12c   : > { %2497 = vmatmul.mubr.f32.gmra.mxu0 %v3325_v55  ;;  %2519 = vmatmul.mubr.f32.gmra.mxu1 %v812_v12 }
 0x12d   : > { %2539 = vmatprep.subr.mxu0 %v3318_v52  ;;  %2559 = vmatprep.subr.mxu1 %v3156_v25 }
 0x12e   : > { %2540 = vmatpush3.msra.mxu0 %v3318_v52  ;;  %2560 = vmatpush3.msra.mxu1 %v3156_v25  ;;  %v665_v46 = vpop.permute.xlu0 %664 }
 0x12f   : > { %2541 = vmatprep.subr.mxu0 %v3311_v41  ;;  %2561 = vmatprep.subr.mxu1 %v3204_v21 }
 0x130   : > { %2521 = vmatprep.mubr.f32.mxu1 %v822_v24  ;;  %2542 = vmatpush3.msra.mxu0 %v3311_v41 }
 0x131   : > { %2543 = vmatprep.mubr.f32.mxu0 %v3090_v27  ;;  %2562 = vmatpush3.msra.mxu1 %v3204_v21 }
 0x132   : > { %2522 = vmatmul.mubr.f32.gmra.mxu1 %v832_v49  ;;  %2544 = vmatmul.mubr.f32.vlgmr.msra.gmra.mxu0 %v3233_v40  ;;  %v655_v33 = vpop.permute.xlu0 %654 }
 0x133   : > { %2563 = vmatprep.subr.mxu1 %v3187_v4  ;;  %2524 = vmatprep.mubr.f32.mxu1 %v842_v63 }
 0x134   : > { %2564 = vmatpush3.msra.mxu1 %v3187_v4  ;;  %2546 = vmatprep.mubr.f32.mxu0 %v3240_v50 }
 0x135   : > { %2565 = vmatprep.subr.mxu1 %v3199_v20 }
 0x136   : > { %2566 = vmatpush3.msra.mxu1 %v3199_v20  ;;  %2547 = vmatmul.mubr.f32.gmra.mxu0 %v3255_v58  ;;  %v645_v10 = vpop.permute.xlu0 %644 }
 0x137   : > { %2525 = vmatmul.mubr.f32.gmra.mxu1 %v852_v8  ;;  %2567 = vmatprep.subr.mxu1 %v3296_v22 }
 0x138   : > { %2568 = vmatpush3.msra.mxu1 %v3296_v22  ;;  %2549 = vmatprep.mubr.f32.mxu0 %v3262_v0 }
 0x139   : > { %2569 = vmatprep.subr.mxu1 %v3286_v18  ;;  %2571 = vmatprep.mubr.f32.mxu1 %v3090_v27  ;;  %v2898_v27 = vmov 0.0  }
 0x13a   : > { %2570 = vmatpush3.msra.mxu1 %v3286_v18  ;;  %2550 = vmatmul.mubr.f32.gmra.mxu0 %v3272_v6  ;;  %v670_v18 = vpop.permute.xlu1 %669 }
 0x13b   : > { %2572 = vmatmul.mubr.f32.vlgmr.msra.gmra.mxu1 %v3233_v40  ;;  %2552 = vmatprep.mubr.f32.mxu0 %v3294_v48 }
 0x13c   : > { %2574 = vmatprep.mubr.f32.mxu1 %v3240_v50  ;;  %2583 = vmatprep.subr.mxu0 %v2898_v27 }
 0x13d   : > { %2602 = vmatprep.subr.mxu1 %v2898_v27 }
 0x13e   : > { %2553 = vmatmul.mubr.f32.gmra.mxu0 %v3302_v26  ;;  %v660_v24 = vpop.permute.xlu1 %659 }
 0x13f   : > { %2575 = vmatmul.mubr.f32.gmra.mxu1 %v3255_v58  ;;  %2599 = vmatprep.mubr.msk.f32.mxu0 %vm2899_vm1, %v2898_v27 }
 0x140   : > { %2577 = vmatprep.mubr.f32.mxu1 %v3262_v0 }
 0x142   : > { %v650_v56 = vpop.permute.xlu1 %649 }
 0x143   : > { %2578 = vmatmul.mubr.f32.gmra.mxu1 %v3272_v6 }
 0x144   : > { %2580 = vmatprep.mubr.f32.mxu1 %v3294_v48 }
 0x147   : > { %2581 = vmatmul.mubr.f32.gmra.mxu1 %v3302_v26 }
 0x148   : > { %2618 = vmatprep.mubr.msk.f32.mxu1 %vm2899_vm1, %v2898_v27 }
 0x1c5   : > { %v2433_v29 = vpop.f32.mrf.mxu0 }
 0x1c6   : > { %v797_v62 = vadd.f32 %v2433_v29, %v650_v56 }
 0x1c7   : > { %v786_v30 = vpop.f32.mrf.mxu0 }
 0x1c8   : > { %v787_v13 = vadd.f32 %v786_v30, %v645_v10 }
 0x1c9   : > { %v2436_v14 = vpop.f32.mrf.mxu0 }
 0x1ca   : > { %v817_v36 = vadd.f32 %v2436_v14, %v660_v24 }
 0x1cb   : > { %v806_v19 = vpop.f32.mrf.mxu0 }
 0x1cc   : > { %v807_v52 = vadd.f32 %v806_v19, %v655_v33 }
 0x1ce   : > { %v2439_v25 = vpop.f32.mrf.mxu0  ;;  %v2461_v38 = vpop.f32.mrf.mxu1 }
 0x1cf   : > { %v837_v49 = vadd.f32 %v2439_v25, %v670_v18  ;;  %v974_v34 = vadd.f32 %v2461_v38, %v797_v62 }
 0x1d0   : > { %v826_v45 = vpop.f32.mrf.mxu0  ;;  %v967_v53 = vpop.f32.mrf.mxu1 }
 0x1d1   : > { %v827_v59 = vadd.f32 %v826_v45, %v665_v46  ;;  %v968_v45 = vadd.f32 %v967_v53, %v787_v13 }
 0x1d4   : > { %v2442_v4 = vpop.f32.mrf.mxu0  ;;  %v2464_v15 = vpop.f32.mrf.mxu1 }
 0x1d5   : > { %v986_v54 = vadd.f32 %v2464_v15, %v817_v36  ;;  %v857_v16 = vadd.f32 %v2442_v4, %v680_v3 }
 0x1d6   : > { %v846_v20 = vpop.f32.mrf.mxu0  ;;  %v979_v21 = vpop.f32.mrf.mxu1 }
 0x1d7   : > { %v980_v63 = vadd.f32 %v979_v21, %v807_v52  ;;  %v847_v19 = vadd.f32 %v846_v20, %v675_v5 }
 0x1da   : > { %v2467_v23 = vpop.f32.mrf.mxu1  ;;  %v2489_v28 = vpop.f32.mrf.mxu0 }
 0x1db   : > { %v998_v60 = vadd.f32 %v2467_v23, %v837_v49  ;;  %v1105_v23 = vadd.f32 %v2489_v28, %v974_v34 }
 0x1dc   : > { %v991_v31 = vpop.f32.mrf.mxu1  ;;  %v3456_v37 = vpop.f32.mrf.mxu0 }
 0x1dd   : > { %v992_v11 = vadd.f32 %v991_v31, %v827_v59  ;;  %v1098_v30 = vadd.f32 %v3456_v37, %v968_v45 }
 0x1e0   : > { %v2470_v39 = vpop.f32.mrf.mxu1  ;;  %v2492_v40 = vpop.f32.mrf.mxu0 }
 0x1e1   : > { %v1119_v1 = vadd.f32 %v2492_v40, %v986_v54  ;;  %v1010_v15 = vadd.f32 %v2470_v39, %v857_v16 }
 0x1e2   : > { %v1003_v50 = vpop.f32.mrf.mxu1  ;;  %v1111_v57 = vpop.f32.mrf.mxu0 }
 0x1e3   : > { %v1112_v14 = vadd.f32 %v1111_v57, %v980_v63  ;;  %v1004_v36 = vadd.f32 %v1003_v50, %v847_v19 }
 0x1e6   : > { %v2495_v58 = vpop.f32.mrf.mxu0  ;;  %v2517_v61 = vpop.f32.mrf.mxu1 }
 0x1e7   : > { %v1133_v44 = vadd.f32 %v2495_v58, %v998_v60  ;;  %v1236_v38 = vadd.f32 %v2517_v61, %v1105_v23 }
 0x1e8   : > { %v1125_v0 = vpop.f32.mrf.mxu0  ;;  %v3458_v2 = vpop.f32.mrf.mxu1 }
 0x1e9   : > { %v1126_v24 = vadd.f32 %v1125_v0, %v992_v11  ;;  %v1228_v53 = vadd.f32 %v3458_v2, %v1098_v30 }
 0x1ec   : > { %v2498_v6 = vpop.f32.mrf.mxu0  ;;  %v2520_v9 = vpop.f32.mrf.mxu1 }
 0x1ed   : > { %v1252_v25 = vadd.f32 %v2520_v9, %v1119_v1  ;;  %v1147_v49 = vadd.f32 %v2498_v6, %v1010_v15 }
 0x1ee   : > { %v1139_v12 = vpop.f32.mrf.mxu0  ;;  %v1243_v17 = vpop.f32.mrf.mxu1 }
 0x1ef   : > { %v1244_v29 = vadd.f32 %v1243_v17, %v1112_v14  ;;  %v1140_v20 = vadd.f32 %v1139_v12, %v1004_v36 }
 0x1f2   : > { %v2523_v42 = vpop.f32.mrf.mxu1  ;;  %v2545_v48 = vpop.f32.mrf.mxu0 }
 0x1f3   : > { %v1268_v33 = vadd.f32 %v2523_v42, %v1133_v44  ;;  %v1385_v28 = vadd.f32 %v2545_v48, %v1236_v38  ;;  %v1553_v48 = vld [vmem:[%s3743_s7] sm:$0x3] }
 0x1f4   : > { %v1259_v22 = vpop.f32.mrf.mxu1  ;;  %v1378_v47 = vpop.f32.mrf.mxu0 }
 0x1f5   : > { %v1260_v4 = vadd.f32 %v1259_v22, %v1126_v24 }
 0x1f6   : > { %v2548_v26 = vpop.f32.mrf.mxu0 }
 0x1f7   : > { %v2526_v32 = vpop.f32.mrf.mxu1  ;;  %v1397_v21 = vadd.f32 %v2548_v26, %v1252_v25  ;;  %v1379_v26 = vadd.f32 %v1378_v47, %v1228_v53  ;;  %v1561_v47 = vsel %vm682_vm0, %v1553_v48, 0 }
 0x1f8   : > { %v1390_v35 = vpop.f32.mrf.mxu0  ;;  %v1284_v39 = vadd.f32 %v2526_v32, %v1147_v49  ;;  %v3468_v56 = vand.u32 4294901760, %v1561_v47 }
 0x1f9   : > { %v1275_v41 = vpop.f32.mrf.mxu1  ;;  %v1391_v57 = vadd.f32 %v1390_v35, %v1244_v29 }
 0x1fa   : > { %v2551_v51 = vpop.f32.mrf.mxu0  ;;  %v1276_v50 = vadd.f32 %v1275_v41, %v1140_v20  ;;  %v3480_v16 = vsub.f32 %v1561_v47, %v3468_v56  ;;  %v1558_v47 = vpop.permute.xlu1 %1557 }
 0x1fb   : > { %v2573_v55 = vpop.f32.mrf.mxu1  ;;  %v1409_v31 = vadd.f32 %v2551_v51, %v1268_v33 }
 0x1fc   : > { %v1402_v7 = vpop.f32.mrf.mxu0  ;;  %v1506_v37 = vadd.f32 %v2573_v55, %v1385_v28  ;;  %v1638_v45 = vand.u32 4294901760, %v3480_v16 }
 0x1fd   : > { %v1499_v8 = vpop.f32.mrf.mxu1  ;;  %v1403_v0 = vadd.f32 %v1402_v7, %v1260_v4 }
 0x1fe   : > { %v2554_v40 = vpop.f32.mrf.mxu0  ;;  %v1500_v32 = vadd.f32 %v1499_v8, %v1379_v26  ;;  %v1639_v30 = vsub.f32 %v3480_v16, %v1638_v45 }
 0x1ff   : > { %v2576_v18 = vpop.f32.mrf.mxu1  ;;  %v1421_v6 = vadd.f32 %v2554_v40, %v1284_v39 }
 0x200   : > { %v1518_v58 = vadd.f32 %v2576_v18, %v1397_v21  ;;  %v1414_v9 = vpop.f32.mrf.mxu0 }
 0x201   : > { %v1511_v46 = vpop.f32.mrf.mxu1  ;;  %v1415_v35 = vadd.f32 %v1414_v9, %v1276_v50 }
 0x202   : > { %v1512_v17 = vadd.f32 %v1511_v46, %v1391_v57 }
 0x203   : > { %v2579_v3 = vpop.f32.mrf.mxu1 }
 0x204   : > { %v1530_v5 = vadd.f32 %v2579_v3, %v1409_v31 }
 0x205   : > { %v1523_v42 = vpop.f32.mrf.mxu1 }
 0x206   : > { %2783 = vtanh.f32 %v1530_v5  ;;  %v1524_v22 = vadd.f32 %v1523_v42, %v1403_v0  ;;  %v1640_v5 = vand.u32 4294901760, %v1639_v30 }
 0x207   : > { %2785 = vtanh.f32 %v1518_v58  ;;  %v2582_v61 = vpop.f32.mrf.mxu1 }
 0x208   : > { %2787 = vtanh.f32 %v1524_v22  ;;  %v1542_v12 = vadd.f32 %v2582_v61, %v1421_v6 }
 0x209   : > { %2789 = vtanh.f32 %v1512_v17  ;;  %v1535_v51 = vpop.f32.mrf.mxu1 }
 0x20a   : > { %2791 = vtanh.f32 %v1542_v12  ;;  %v1536_v2 = vadd.f32 %v1535_v51, %v1415_v35 }
 0x20b   : > { %2793 = vtanh.f32 %v1506_v37 }
 0x20c   : > { %2795 = vtanh.f32 %v1536_v2 }
 0x20d   : > { %2797 = vtanh.f32 %v1500_v32 }
 0x213   : > { %v2784_v41 = vpop.eup %2783 }
 0x214   : > { %v2786_v52 = vpop.eup %2785  ;;  %v3466_v54 = vand.u32 4294901760, %v2784_v41 }
 0x215   : > { %v2788_v55 = vpop.eup %2787  ;;  %v3474_v7 = vand.u32 4294901760, %v2786_v52 }
 0x216   : > { %v2790_v59 = vpop.eup %2789  ;;  %v3470_v60 = vand.u32 4294901760, %v2788_v55  ;;  %v3477_v8 = vsub.f32 %v2784_v41, %v3466_v54 }
 0x217   : > { %v2792_v62 = vpop.eup %2791  ;;  %v3488_v34 = vand.u32 4294901760, %v2790_v59  ;;  %v3503_v24 = vsub.f32 %v2786_v52, %v3474_v7 }
 0x218   : > { %v2794_v63 = vpop.eup %2793  ;;  %v3472_v1 = vand.u32 4294901760, %v2792_v62  ;;  %v3491_v14 = vsub.f32 %v2788_v55, %v3470_v60  ;;  %v1679_v15 = vand.u32 4294901760, %v3477_v8 }
 0x219   : > { %v2796_v10 = vpop.eup %2795  ;;  %v3494_v25 = vand.u32 4294901760, %v2794_v63  ;;  %v3516_v40 = vsub.f32 %v2790_v59, %v3488_v34  ;;  %v1693_v31 = vand.u32 4294901760, %v3503_v24 }
 0x21a   : > { %v2798_v11 = vpop.eup %2797  ;;  %2584 = vmatpush3.msra.mxu0 %v3472_v1  ;;  %v3483_v44 = vand.u32 4294901760, %v2796_v10  ;;  %v3486_v13 = vsub.f32 %v2792_v62, %v3472_v1  ;;  %v1686_v21 = vand.u32 4294901760, %v3491_v14  ;;  %v1680_v4 = vsub.f32 %v3477_v8, %v1679_v15 }
 0x21b   : > { %2585 = vmatprep.subr.mxu0 %v2898_v27  ;;  %v3506_v33 = vand.u32 4294901760, %v2798_v11  ;;  %v3520_v46 = vsub.f32 %v2794_v63, %v3494_v25  ;;  %v1700_v58 = vand.u32 4294901760, %v3516_v40  ;;  %v1694_v39 = vsub.f32 %v3503_v24, %v1693_v31 }
 0x21c   : > { %2586 = vmatpush3.msra.mxu0 %v3483_v44  ;;  %v1665_v18 = vand.u32 4294901760, %v3486_v13  ;;  %v3499_v19 = vsub.f32 %v2796_v10, %v3483_v44  ;;  %v1687_v57 = vsub.f32 %v3491_v14, %v1686_v21  ;;  %v1681_v20 = vand.u32 4294901760, %v1680_v4 }
 0x21d   : > { %2587 = vmatprep.subr.mxu0 %v2898_v27  ;;  %v3540_v3 = vsub.f32 %v2798_v11, %v3506_v33  ;;  %v1707_v0 = vand.u32 4294901760, %v3520_v46  ;;  %v1701_v28 = vsub.f32 %v3516_v40, %v1700_v58  ;;  %v1695_v17 = vand.u32 4294901760, %v1694_v39 }
 0x21e   : > { %2588 = vmatpush3.msra.mxu0 %v3466_v54  ;;  %v1666_v23 = vsub.f32 %v3486_v13, %v1665_v18  ;;  %v1672_v29 = vand.u32 4294901760, %v3499_v19  ;;  %v1688_v53 = vand.u32 4294901760, %v1687_v57 }
 0x21f   : > { %2589 = vmatprep.subr.mxu0 %v2898_v27  ;;  %v1714_v9 = vand.u32 4294901760, %v3540_v3  ;;  %v1708_v42 = vsub.f32 %v3520_v46, %v1707_v0  ;;  %v1702_v50 = vand.u32 4294901760, %v1701_v28 }
 0x220   : > { %2590 = vmatpush3.msra.mxu0 %v3470_v60  ;;  %v1667_v36 = vand.u32 4294901760, %v1666_v23  ;;  %v1673_v49 = vsub.f32 %v3499_v19, %v1672_v29 }
 0x221   : > { %2591 = vmatprep.subr.mxu0 %v2898_v27  ;;  %v1715_v6 = vsub.f32 %v3540_v3, %v1714_v9  ;;  %v1709_v22 = vand.u32 4294901760, %v1708_v42 }
 0x222   : > { %2592 = vmatpush3.msra.mxu0 %v3474_v7  ;;  %2603 = vmatpush3.msra.mxu1 %v1667_v36  ;;  %v1674_v38 = vand.u32 4294901760, %v1673_v49 }
 0x223   : > { %2593 = vmatprep.subr.mxu0 %v2898_v27  ;;  %2604 = vmatprep.subr.mxu1 %v2898_v27  ;;  %v1716_v26 = vand.u32 4294901760, %v1715_v6 }
 0x224   : > { %2594 = vmatpush3.msra.mxu0 %v3488_v34  ;;  %2605 = vmatpush3.msra.mxu1 %v1674_v38 }
 0x225   : > { %2595 = vmatprep.subr.mxu0 %v2898_v27  ;;  %2606 = vmatprep.subr.mxu1 %v2898_v27 }
 0x226   : > { %2596 = vmatpush3.msra.mxu0 %v3494_v25  ;;  %2607 = vmatpush3.msra.mxu1 %v1681_v20 }
 0x227   : > { %2597 = vmatprep.subr.mxu0 %v2898_v27  ;;  %2608 = vmatprep.subr.mxu1 %v2898_v27 }
 0x228   : > { %2598 = vmatpush3.msra.mxu0 %v3506_v33  ;;  %2609 = vmatpush3.msra.mxu1 %v1688_v53 }
 0x229   : > { %2600 = vmatmul.mubr.f32.vlgmr.msra.gmra.mxu0 %v1640_v5  ;;  %2610 = vmatprep.subr.mxu1 %v2898_v27 }
 0x22a   : > { %2621 = vmatprep.subr.mxu0 %v2898_v27  ;;  %2611 = vmatpush3.msra.mxu1 %v1695_v17 }
 0x22b   : > { %2622 = vmatpush3.msra.mxu0 %v3486_v13  ;;  %2612 = vmatprep.subr.mxu1 %v2898_v27  ;;  %v2801_v13 = vld [vmem:[%s3121_s28] sm:$0x1]  ;;  %s2901_s28 = smov [#allocation2]  }
 0x22c   : > { %2623 = vmatprep.subr.mxu0 %v2898_v27  ;;  %2613 = vmatpush3.msra.mxu1 %v1702_v50  ;;  %s2807_s1 = sshll.u32 %s2901_s28, 4  ;;  %s2808_s1 = int_to_ptr.vmem [resolvable:$false] %s2807_s1 }
 0x22d   : > { %2624 = vmatpush3.msra.mxu0 %v3499_v19  ;;  %2614 = vmatprep.subr.mxu1 %v2898_v27  ;;  %s2809_s2 = scalar_lea.vmem %s2808_s1, 32  ;;  %p2810_p0 = scmp.lt.s32.totalorder %s3668_s11, %s2808_s1 }
 0x22e   : > { %2625 = vmatprep.subr.mxu0 %v2898_v27  ;;  %2615 = vmatpush3.msra.mxu1 %v1709_v22  ;;  %p2811_p1 = scmp.lt.s32.totalorder %s2809_s2, %s2803_s20 }
 0x22f   : > { %2626 = vmatpush3.msra.mxu0 %v3477_v8  ;;  %2616 = vmatprep.subr.mxu1 %v2898_v27 }
 0x230   : > { %2627 = vmatprep.subr.mxu0 %v2898_v27  ;;  %2617 = vmatpush3.msra.mxu1 %v1716_v26  ;;  %p2812_p2 = por %p2811_p1, %p2810_p0 }
 0x231   : > { %2628 = vmatpush3.msra.mxu0 %v3491_v14  ;;  %2619 = vmatmul.mubr.f32.vlgmr.msra.gmra.mxu1 %v3468_v56 }
 0x232   : > { %2629 = vmatprep.subr.mxu0 %v2898_v27  ;;  %2640 = vmatprep.subr.mxu1 %v2898_v27  ;;  %p2813_p3 = pnand %p2812_p2, %p2806_p13 }
 0x233   : > { %2630 = vmatpush3.msra.mxu0 %v3503_v24  ;;  %2641 = vmatpush3.msra.mxu1 %v3472_v1 }
 0x234   : > { %2631 = vmatprep.subr.mxu0 %v2898_v27  ;;  %2642 = vmatprep.subr.mxu1 %v2898_v27 }
 0x235   : > { %2632 = vmatpush3.msra.mxu0 %v3516_v40  ;;  %2643 = vmatpush3.msra.mxu1 %v3483_v44 }
 0x236   : > { %2633 = vmatprep.subr.mxu0 %v2898_v27  ;;  %2644 = vmatprep.subr.mxu1 %v2898_v27 }
 0x237   : > { %2634 = vmatpush3.msra.mxu0 %v3520_v46  ;;  %2645 = vmatpush3.msra.mxu1 %v3466_v54 }
 0x238   : > { %2635 = vmatprep.subr.mxu0 %v2898_v27  ;;  %2646 = vmatprep.subr.mxu1 %v2898_v27 }
 0x239   : > { %2636 = vmatpush3.msra.mxu0 %v3540_v3  ;;  %2637 = vmatprep.mubr.msk.f32.mxu0 %vm2899_vm1, %v2898_v27 }
 0x23a   : > { %2647 = vmatpush3.msra.mxu1 %v3470_v60  ;;  %2638 = vmatmul.mubr.f32.vlgmr.msra.gmra.mxu0 %v3480_v16 }
 0x23b   : > { %2648 = vmatprep.subr.mxu1 %v2898_v27  ;;  %2659 = vmatprep.subr.mxu0 %v2898_v27 }
 0x23c   : > { %2649 = vmatpush3.msra.mxu1 %v3474_v7  ;;  %2660 = vmatpush3.msra.mxu0 %v1665_v18 }
 0x23d   : > { %2650 = vmatprep.subr.mxu1 %v2898_v27  ;;  %2661 = vmatprep.subr.mxu0 %v2898_v27 }
 0x23e   : > { %2651 = vmatpush3.msra.mxu1 %v3488_v34  ;;  %2662 = vmatpush3.msra.mxu0 %v1672_v29 }
 0x23f   : > { %2652 = vmatprep.subr.mxu1 %v2898_v27  ;;  %2663 = vmatprep.subr.mxu0 %v2898_v27 }
 0x240   : > { %2653 = vmatpush3.msra.mxu1 %v3494_v25  ;;  %2664 = vmatpush3.msra.mxu0 %v1679_v15 }
 0x241   : > { %2654 = vmatprep.subr.mxu1 %v2898_v27  ;;  %2665 = vmatprep.subr.mxu0 %v2898_v27 }
 0x242   : > { %2655 = vmatpush3.msra.mxu1 %v3506_v33  ;;  %2656 = vmatprep.mubr.msk.f32.mxu1 %vm2899_vm1, %v2898_v27 }
 0x243   : > { %2666 = vmatpush3.msra.mxu0 %v1686_v21  ;;  %2657 = vmatmul.mubr.f32.vlgmr.msra.gmra.mxu1 %v1638_v45 }
 0x244   : > { %2667 = vmatprep.subr.mxu0 %v2898_v27  ;;  %2678 = vmatprep.subr.mxu1 %v2898_v27 }
 0x245   : > { %2668 = vmatpush3.msra.mxu0 %v1693_v31  ;;  %2679 = vmatpush3.msra.mxu1 %v3472_v1 }
 0x246   : > { %2669 = vmatprep.subr.mxu0 %v2898_v27  ;;  %2680 = vmatprep.subr.mxu1 %v2898_v27 }
 0x247   : > { %2670 = vmatpush3.msra.mxu0 %v1700_v58  ;;  %2681 = vmatpush3.msra.mxu1 %v3483_v44 }
 0x248   : > { %2671 = vmatprep.subr.mxu0 %v2898_v27  ;;  %2682 = vmatprep.subr.mxu1 %v2898_v27 }
 0x249   : > { %2672 = vmatpush3.msra.mxu0 %v1707_v0  ;;  %2683 = vmatpush3.msra.mxu1 %v3466_v54  ;;  %v2900_v54 = vmov 1966171168  }
 0x24a   : > { %2673 = vmatprep.subr.mxu0 %v2898_v27  ;;  %2684 = vmatprep.subr.mxu1 %v2898_v27  ;;  %v2103_v55 = vunpack.c.l.s4 %v2900_v54 }
 0x24b   : > { %2674 = vmatpush3.msra.mxu0 %v1714_v9  ;;  %2675 = vmatprep.mubr.msk.f32.mxu0 %vm2899_vm1, %v2898_v27 }
 0x24c   : > { %2685 = vmatpush3.msra.mxu1 %v3470_v60  ;;  %2676 = vmatmul.mubr.f32.vlgmr.msra.gmra.mxu0 %v3468_v56  ;;  %v2104_v62 = vunpack.c.0.s8 %v2103_v55 }
 0x24d   : > { %2686 = vmatprep.subr.mxu1 %v2898_v27  ;;  %2694 = vmatprep.mubr.msk.f32.mxu1 %vm2899_vm1, %v2898_v27 }
 0x24e   : > { %2687 = vmatpush3.msra.mxu1 %v3474_v7  ;;  %v2107_v1 = vsub.s32 %v2104_v62, %v3113_v43 }
 0x24f   : > { %2688 = vmatprep.subr.mxu1 %v2898_v27 }
 0x250   : > { %2689 = vmatpush3.msra.mxu1 %v3488_v34 }
 0x251   : > { %2690 = vmatprep.subr.mxu1 %v2898_v27 }
 0x252   : > { %2691 = vmatpush3.msra.mxu1 %v3494_v25 }
 0x253   : > { %2692 = vmatprep.subr.mxu1 %v2898_v27 }
 0x254   : > { %2693 = vmatpush3.msra.mxu1 %v3506_v33 }
 0x255   : > { %2695 = vmatmul.mubr.f32.vlgmr.msra.gmra.mxu1 %v3468_v56 }
 0x2e9   : > { %v1642_v37 = vpop.f32.mrf.mxu0 }
 0x2ea   : > { %v1643_v41 = vadd.f32 %v1642_v37, %v1558_v47 }
 0x2eb   : > { %v2601_v61 = vpop.f32.mrf.mxu0 }
 0x2f1   : > { %v1753_v35 = vpop.f32.mrf.mxu1 }
 0x2f2   : > { %v1754_v59 = vadd.f32 %v1753_v35, %v1643_v41 }
 0x2f3   : > { %v2620_v12 = vpop.f32.mrf.mxu1 }
 0x2fa   : > { %v1841_v32 = vpop.f32.mrf.mxu0 }
 0x2fb   : > { %v1842_v60 = vadd.f32 %v1841_v32, %v1754_v59 }
 0x2fc   : > { %v2639_v51 = vpop.f32.mrf.mxu0 }
 0x303   : > { %v1922_v2 = vpop.f32.mrf.mxu1 }
 0x304   : > { %v1923_v56 = vadd.f32 %v1922_v2, %v1842_v60 }
 0x305   : > { %v2658_v48 = vpop.f32.mrf.mxu1 }
 0x30c   : > { %v2017_v52 = vpop.f32.mrf.mxu0 }
 0x30d   : > { %v2018_v63 = vadd.f32 %v2017_v52, %v1923_v56 }
 0x30e   : > { %v2677_v27 = vpop.f32.mrf.mxu0 }
 0x315   : > { %v2096_v7 = vpop.f32.mrf.mxu1 }
 0x316   : > { %v2097_v8 = vadd.f32 %v2096_v7, %v2018_v63 }
 0x317   : > { %v2696_v10 = vpop.f32.mrf.mxu1 }
 0x318   : > { %v2108_v16 = vrot.slane %v2097_v8, %v2107_v1  ;;  %v2100_v18 = vmul.f32 %v2097_v8, %v2097_v8 }
 0x31a   : > { %v2109_v11 = vcombine.high %v2108_v16, %v2108_v16 }
 0x31c   : > { %v2116_v44 = vrot.slane %v2109_v11, %v2107_v1 }
 0x31e   : > { %v2118_v34 = vsub.f32 %v2801_v13, %v2116_v44 }
 0x320   : > { %v2119_v14 = vmul.f32 %v2118_v34, %v2118_v34 }
 0x322   : > { %v2120_v25 = vadd.f32 0.0025, %v2119_v14 }
 0x324   : > { %2799 = vrcp.f32 %v2120_v25 }
 0x331   : > { %v2800_v19 = vpop.eup %2799 }
 0x332   : > { %v2122_v43 = vmul.f32 %v2800_v19, %v2100_v18 }
 0x334   : > { %v2123_v15 = vmul.f32 %v2122_v43, %v2118_v34  ;;  %v2125_v24 = vmul.f32 0.0025, %v2122_v43 }
 0x336   : > { %2124 = vst [vmem:[%s373_s30] sm:$0x1] %v2123_v15  ;;  %2126 = vst [vmem:[%s379_s12] sm:$0x1] %v2125_v24 }
 0x337   : > { %2816 = shalt.err (!%p2813_p3)
}
 0x338   : > { %s2817_s29 = scalar_lea.hbm %s3666_s21, 16  ;;  %s2821_s17 = scalar_lea.hbm %s3745_s9, 32 }
 0x339   : > { %p2818_p4 = scmp.ne.s32.totalorder %s3666_s21, %s2817_s29  ;;  %p2822_p9 = scmp.lt.s32.totalorder %s3666_s21, %s3745_s9 }
 0x33a   : > { %p2823_p10 = scmp.lt.s32.totalorder %s2821_s17, %s2817_s29 }
 0x33b   : > { %p2819_p7 = pnand %p2818_p4, %p2996_p5 }
 0x33c   : > { %p2824_p11 = por %p2823_p10, %p2822_p9 }
 0x33d   : > { %p2820_p8 = pneg %p2819_p7 }
 0x33f   : > { %p2825_p12 = pnand %p2824_p11, %p2820_p8 }
 0x341   : > { %2828 = shalt.err (!%p2825_p12)
}
 0x342   : > { %2697 = dma.vmem_to_hbm [thread:$0]  (%p2996_p5), %s3668_s11, 16, %s3666_s21, %s2128_s0  }
 0x343   : > { %s2132_s1 = scalar_lea.sflag [#allocation5], %s3658_s27  ;;  %s2829_s2 = scalar_lea.vmem %s3675_s18, 16 }
 0x344   : > { %p2830_p13 = scmp.ne.s32.totalorder %s3675_s18, %s2829_s2  ;;  %s2902_s20 = smov [#allocation4]  }
 0x345   : > { %s2833_s29 = sshll.u32 %s2902_s20, 4  ;;  %s2834_s29 = int_to_ptr.vmem [resolvable:$false] %s2833_s29 }
 0x346   : > { %p2831_p0 = pnand %p2830_p13, %p2996_p5  ;;  %s2835_s30 = scalar_lea.vmem %s2834_s29, 32 }
 0x347   : > { %p2836_p2 = scmp.lt.s32.totalorder %s3675_s18, %s2834_s29  ;;  %p2837_p3 = scmp.lt.s32.totalorder %s2835_s30, %s2829_s2 }
 0x348   : > { %p2832_p1 = pneg %p2831_p0 }
 0x349   : > { %p2838_p4 = por %p2837_p3, %p2836_p2 }
 0x34b   : > { %p2839_p7 = pnand %p2838_p4, %p2832_p1 }
 0x34d   : > { %2842 = shalt.err (!%p2839_p7)
}
 0x34e   : > { %s2843_s0 = scalar_lea.hbm %s3673_s26, 16  ;;  %s2847_s21 = scalar_lea.hbm %s3746_s10, 32 }
 0x34f   : > { %p2844_p8 = scmp.ne.s32.totalorder %s3673_s26, %s2843_s0  ;;  %p2848_p11 = scmp.lt.s32.totalorder %s3673_s26, %s3746_s10 }
 0x350   : > { %p2849_p12 = scmp.lt.s32.totalorder %s2847_s21, %s2843_s0 }
 0x351   : > { %p2845_p9 = pnand %p2844_p8, %p2996_p5 }
 0x352   : > { %p2850_p13 = por %p2849_p12, %p2848_p11 }
 0x353   : > { %p2846_p10 = pneg %p2845_p9 }
 0x355   : > { %p2851_p0 = pnand %p2850_p13, %p2846_p10 }
 0x357   : > { %2854 = shalt.err (!%p2851_p0)
}
 0x358   : > { %2698 = dma.vmem_to_hbm [thread:$0]  (%p2996_p5), %s3675_s18, 16, %s3673_s26, %s2132_s1  }
 0x359 PF: > { %p2708_p1 = scmp.ge.s32.totalorder %s2893_s16, 2  ;;  %s2169_s25 = sand.u32 1, %s2881_s13  }
 0x35a   : > { %s2170_s28 = scalar_lea.sflag [#allocation3], %s2169_s25 }
 0x35b   : > { %p2702_p2 = pnand %p2708_p1, %p3000_p6 }
 0x35d   : > { %p2703_p3 = pneg %p2702_p2 }
 0x35f   : > { %2872 = dma.done.wait (%p2703_p3), %s2170_s28, 16  }
 0x360   : > { %2874 = vsyncadd (%p2703_p3), %s2170_s28, 4294967280  ;;  %s2178_s2 = scalar_lea.sflag [#allocation5], %s2169_s25 }
 0x361   : > { %2876 = dma.done.wait (%p2703_p3), %s2178_s2, 16  }
 0x362   : > { %2878 = vsyncadd (%p2703_p3), %s2178_s2, 4294967280  ;;  %p24_p5 = scmp.ge.s32.totalorder %s2983_s19, 4   ;;  %s3755_s13 = smov %s2885_s14 }
 0x363   : > { %s3756_s14 = smov %s2889_s15  ;;  %s3757_s15 = smov %s2994_s22 }
 0x364   : > { %s3758_s16 = smov %s2983_s19  ;;  %26 = sbr.rel (!%p24_p5) target bundleno = 9 (0x9), region = 114 }
 0x369   :  { %2182 = vsyncpa [#allocation3], 1 }
 0x36a   :  { %2184 = vsyncpa [#allocation3 + $0x1], 1 }
 0x36b   :  { %2185 = vsyncpa [#allocation5], 1 }
 0x36c   :  { %2187 = vsyncpa [#allocation5 + $0x1], 1 }

</bundles_post_ra>
